<compile_context>
chip_gen: v7x
topology: tpu7x:2x2x1
jax: 0.10.0
libtpu: 0.0.40
codegen_flags: <defaults>
</compile_context>

<pallas_src>
import jax
import jax.numpy as jnp
from jax.experimental import pallas as pl
from jax.experimental.pallas import tpu as pltpu


def _round_up(a: int, b: int) -> int:
    return (a + b - 1) // b * b


def _vmem_capacity_bytes() -> int:
    """Physical VMEM per TensorCore (64 MiB on v7x, 128 MiB on v5e/v6e)."""
    try:
        return int(pltpu.get_tpu_info().vmem_capacity_bytes)
    except Exception:
        return 64 * 1024 * 1024  # conservative default (v7x per-core)


def _patch_embed_kernel(x_ref, w_ref, b_ref, o_ref):
    # x_ref: (TM, Kp) patch rows (compute dtype)
    # w_ref: (Kp, E)  projection weight, pre-transposed in the wrapper
    # b_ref: (1, E)   f32 bias
    acc = jnp.dot(x_ref[...], w_ref[...], preferred_element_type=jnp.float32)
    o_ref[...] = (acc + b_ref[...]).astype(o_ref.dtype)


def patch_embed(x, weight, bias, patch_size, *, compute_dtype=jnp.bfloat16,
                out_dtype=None, tm_cap=1024):
    """Pallas implementation of PatchEmbed.forward.

    x      : (N, C, H, W)  NCHW, like PyTorch.
    weight : (E, C, P, P)  conv weight, PyTorch layout.
    bias   : (E,)          conv bias.
    returns: (N, n_patches, E), dtype `out_dtype` (default: x.dtype).
    """
    N, C, H, W = x.shape
    E = weight.shape[0]
    P = patch_size
    if H % P != 0 or W % P != 0:
        raise ValueError("img size must be divisible by patch size")
    Hp, Wp = H // P, W // P
    n_patches = Hp * Wp
    K = C * P * P
    M = N * n_patches
    out_dtype = x.dtype if out_dtype is None else out_dtype

    Kp = _round_up(K, 128)

    # --- im2col: ONE fused copy (transpose + cast (+ K zero-pad)) ---
    # (N, C, Hp, P, Wp, P) is a free reshape of NCHW; the transpose+cast is the
    # single materialization of the patch matrix.
    xp = x.reshape(N, C, Hp, P, Wp, P)
    xp = jnp.transpose(xp, (0, 2, 4, 1, 3, 5)).reshape(M, K).astype(compute_dtype)
    if Kp != K:
        xp = jnp.pad(xp, ((0, 0), (0, Kp - K)))

    # Weight pre-transposed once to (K, E): canonical MXU contraction in-kernel.
    w2d = weight.reshape(E, K).T.astype(compute_dtype)
    if Kp != K:
        w2d = jnp.pad(w2d, ((0, Kp - K), (0, 0)))
    b2d = bias.reshape(1, E).astype(jnp.float32)

    # --- per-generation VMEM budget -> TM (multiple of 128, capped) ---
    cbytes = jnp.dtype(compute_dtype).itemsize
    obytes = jnp.dtype(out_dtype).itemsize
    phys = _vmem_capacity_bytes()
    budget = min((phys * 3) // 4, 64 * 1024 * 1024)  # ~48 MiB v7x, 64 MiB v5e/v6e
    fixed = Kp * E * cbytes + E * 4                   # resident weight + bias
    per_row = 2 * Kp * cbytes + 2 * E * obytes        # dbl-buffered act + out tile
    headroom = 4 * 1024 * 1024                        # compiler internal scratch
    tm = max(128, (budget - fixed - headroom) // per_row)
    tm = min(tm, tm_cap)
    tm = (tm // 128) * 128
    tm = max(8, min(tm, _round_up(M, 8)))             # don't exceed problem size
    grid = (pl.cdiv(M, tm),)                          # ragged tail block, no M pad

    cost = pl.CostEstimate(
        flops=2 * M * Kp * E,
        transcendentals=0,
        bytes_accessed=M * Kp * cbytes + Kp * E * cbytes + E * 4 + M * E * obytes,
    )

    def run(single_buffer_resident):
        res_kw = ({"pipeline_mode": pl.Buffered(1)}
                  if single_buffer_resident else {})
        return pl.pallas_call(
            _patch_embed_kernel,
            out_shape=jax.ShapeDtypeStruct((M, E), out_dtype),
            grid=grid,
            in_specs=[
                pl.BlockSpec((tm, Kp), lambda i: (i, 0)),            # activations
                pl.BlockSpec((Kp, E), lambda i: (0, 0), **res_kw),   # weight (resident)
                pl.BlockSpec((1, E), lambda i: (0, 0), **res_kw),    # bias (resident)
            ],
            out_specs=pl.BlockSpec((tm, E), lambda i: (i, 0)),
            compiler_params=pltpu.CompilerParams(
                dimension_semantics=("parallel",),
                vmem_limit_bytes=int(budget),
                allow_input_fusion=[True, False, False],
            ),
            cost_estimate=cost,
        )(xp, w2d, b2d)

    try:
        out = run(True)
    except Exception:
        # pipeline_mode / Buffered(1) hint not supported by this build: fall
        # back to the default (double-buffered) pipeline. Same results.
        out = run(False)

    # No padding on M or E -> this reshape is free (no slice copy).
    return out.reshape(N, n_patches, E)


if __name__ == "__main__":
    # Small shapes consistent with the module: img=16, patch=4, in_chans=4,
    # embed_dim=32  ->  n_patches = (16//4)**2 = 16.
    batch, in_chans, img_size, patch_size, embed_dim = 2, 4, 16, 4, 32

    key = jax.random.PRNGKey(0)
    kx, kw, kb = jax.random.split(key, 3)

    x = jax.random.normal(kx, (batch, in_chans, img_size, img_size), jnp.float32)
    # Deterministic synthetic Conv2d(in_chans, embed_dim, P, stride=P) params.
    fan_in = in_chans * patch_size * patch_size
    bound = 1.0 / jnp.sqrt(fan_in)
    weight = jax.random.uniform(
        kw, (embed_dim, in_chans, patch_size, patch_size), jnp.float32,
        minval=-bound, maxval=bound)
    bias = jax.random.uniform(kb, (embed_dim,), jnp.float32,
                              minval=-bound, maxval=bound)

    out = patch_embed(x, weight, bias, patch_size)
    out = jax.block_until_ready(out)

    # Reference: strided conv via patch-matmul in plain JAX, with the same
    # bf16 input rounding / f32 accumulation as the kernel's compute_dtype.
    Hp = img_size // patch_size
    x_b = x.astype(jnp.bfloat16).astype(jnp.float32)
    w_b = weight.astype(jnp.bfloat16).astype(jnp.float32)
    xp = x_b.reshape(batch, in_chans, Hp, patch_size, Hp, patch_size)
    xp = jnp.transpose(xp, (0, 2, 4, 1, 3, 5)).reshape(batch, Hp * Hp, -1)
    ref = jnp.einsum("npk,ek->npe", xp, w_b.reshape(embed_dim, -1),
                     preferred_element_type=jnp.float32) + bias

    assert out.shape == (batch, Hp * Hp, embed_dim)
    assert out.dtype == x.dtype
    assert jnp.allclose(out, ref, atol=2e-3, rtol=2e-3)
    print("KERNEL_OK")
</pallas_src>

<mosaic_0001>
module attributes {stable_mosaic.version = 11 : i64} {
  func.func @_patch_embed_kernel(%arg0: i32, %arg1: memref<32x128xbf16, #tpu.memory_space<vmem>>, %arg2: memref<128x32xbf16, #tpu.memory_space<vmem>>, %arg3: memref<1x32xf32, #tpu.memory_space<vmem>>, %arg4: memref<32x32xf32, #tpu.memory_space<vmem>>) attributes {dimension_semantics = [#tpu.dimension_semantics<parallel>], iteration_bounds = array<i64: 1>, scalar_prefetch = 0 : i64, scratch_operands = 0 : i64, tpu.core_type = #tpu.core_type<tc>, window_params = [{transform_indices = @transform_0, window_bounds = array<i64: 32, 128>}, {pipeline_mode = #tpu.pipeline_mode<synchronous>, transform_indices = @transform_1, window_bounds = array<i64: 128, 32>}, {pipeline_mode = #tpu.pipeline_mode<synchronous>, transform_indices = @transform_2, window_bounds = array<i64: 1, 32>}, {transform_indices = @transform_3, window_bounds = array<i64: 32, 32>}]} {
    %c0 = arith.constant 0 : index
    %c0_0 = arith.constant 0 : index
    %0 = vector.load %arg1[%c0, %c0_0] : memref<32x128xbf16, #tpu.memory_space<vmem>>, vector<32x128xbf16>
    %c0_1 = arith.constant 0 : index
    %c0_2 = arith.constant 0 : index
    %1 = vector.load %arg2[%c0_1, %c0_2] : memref<128x32xbf16, #tpu.memory_space<vmem>>, vector<128x32xbf16>
    %cst = arith.constant dense<0.000000e+00> : vector<32x32xf32>
    %2 = tpu.matmul %0, %1, %cst {dimension_numbers = #tpu.dot_dimension_numbers<[1], [0], [0], [1], [0, 0, 1, 1], [], []>} : vector<32x128xbf16>, vector<128x32xbf16>, vector<32x32xf32> -> vector<32x32xf32>
    %c0_3 = arith.constant 0 : index
    %c0_4 = arith.constant 0 : index
    %3 = vector.load %arg3[%c0_3, %c0_4] : memref<1x32xf32, #tpu.memory_space<vmem>>, vector<1x32xf32>
    %4 = vector.broadcast %3 : vector<1x32xf32> to vector<32x32xf32>
    %5 = arith.addf %2, %4 : vector<32x32xf32>
    %c0_5 = arith.constant 0 : index
    %c0_6 = arith.constant 0 : index
    %6 = vector.load %arg4[%c0_5, %c0_6] : memref<32x32xf32, #tpu.memory_space<vmem>>, vector<32x32xf32>
    tpu.vector_store %arg4[%c0_5, %c0_6], %5 {strides = array<i32>} : memref<32x32xf32, #tpu.memory_space<vmem>>, vector<32x32xf32>,
    return
  }
  func.func @transform_0(%arg0: i32) -> (i32, i32) {
    %c0_i32 = arith.constant 0 : i32
    %c0_i32_0 = arith.constant 0 : i32
    return %arg0, %c0_i32 : i32, i32
  }
  func.func @transform_1(%arg0: i32) -> (i32, i32) {
    %c0_i32 = arith.constant 0 : i32
    %c0_i32_0 = arith.constant 0 : i32
    %c0_i32_1 = arith.constant 0 : i32
    return %c0_i32, %c0_i32_0 : i32, i32
  }
  func.func @transform_2(%arg0: i32) -> (i32, i32) {
    %c0_i32 = arith.constant 0 : i32
    %c0_i32_0 = arith.constant 0 : i32
    %c0_i32_1 = arith.constant 0 : i32
    return %c0_i32, %c0_i32_0 : i32, i32
  }
  func.func @transform_3(%arg0: i32) -> (i32, i32) {
    %c0_i32 = arith.constant 0 : i32
    %c0_i32_0 = arith.constant 0 : i32
    return %arg0, %c0_i32 : i32, i32
  }
}

module attributes {stable_mosaic.version = 11 : i64} {
  func.func @_patch_embed_kernel(%arg0: i32, %arg1: memref<32x128xbf16, #tpu.memory_space<vmem>>, %arg2: memref<128x32xbf16, #tpu.memory_space<vmem>>, %arg3: memref<1x32xf32, #tpu.memory_space<vmem>>, %arg4: memref<32x32xf32, #tpu.memory_space<vmem>>) attributes {dimension_semantics = [#tpu.dimension_semantics<parallel>], iteration_bounds = array<i64: 1>, scalar_prefetch = 0 : i64, scratch_operands = 0 : i64, tpu.core_type = #tpu.core_type<tc>, window_params = [{transform_indices = @transform_0, window_bounds = array<i64: 32, 128>}, {pipeline_mode = #tpu.pipeline_mode<synchronous>, transform_indices = @transform_1, window_bounds = array<i64: 128, 32>}, {pipeline_mode = #tpu.pipeline_mode<synchronous>, transform_indices = @transform_2, window_bounds = array<i64: 1, 32>}, {transform_indices = @transform_3, window_bounds = array<i64: 32, 32>}]} {
    %c0 = arith.constant 0 : index
    %c0_0 = arith.constant 0 : index
    %0 = vector.load %arg1[%c0, %c0_0] : memref<32x128xbf16, #tpu.memory_space<vmem>>, vector<32x128xbf16>
    %c0_1 = arith.constant 0 : index
    %c0_2 = arith.constant 0 : index
    %1 = vector.load %arg2[%c0_1, %c0_2] : memref<128x32xbf16, #tpu.memory_space<vmem>>, vector<128x32xbf16>
    %cst = arith.constant dense<0.000000e+00> : vector<32x32xf32>
    %2 = tpu.matmul %0, %1, %cst {dimension_numbers = #tpu.dot_dimension_numbers<[1], [0], [0], [1], [0, 0, 1, 1], [], []>} : vector<32x128xbf16>, vector<128x32xbf16>, vector<32x32xf32> -> vector<32x32xf32>
    %c0_3 = arith.constant 0 : index
    %c0_4 = arith.constant 0 : index
    %3 = vector.load %arg3[%c0_3, %c0_4] : memref<1x32xf32, #tpu.memory_space<vmem>>, vector<1x32xf32>
    %4 = vector.broadcast %3 : vector<1x32xf32> to vector<32x32xf32>
    %5 = arith.addf %2, %4 : vector<32x32xf32>
    %c0_5 = arith.constant 0 : index
    %c0_6 = arith.constant 0 : index
    %6 = vector.load %arg4[%c0_5, %c0_6] : memref<32x32xf32, #tpu.memory_space<vmem>>, vector<32x32xf32>
    tpu.vector_store %arg4[%c0_5, %c0_6], %5 {strides = array<i32>} : memref<32x32xf32, #tpu.memory_space<vmem>>, vector<32x32xf32>,
    return
  }
  func.func @transform_0(%arg0: i32) -> (i32, i32) {
    %c0_i32 = arith.constant 0 : i32
    %c0_i32_0 = arith.constant 0 : i32
    return %arg0, %c0_i32 : i32, i32
  }
  func.func @transform_1(%arg0: i32) -> (i32, i32) {
    %c0_i32 = arith.constant 0 : i32
    %c0_i32_0 = arith.constant 0 : i32
    %c0_i32_1 = arith.constant 0 : i32
    return %c0_i32, %c0_i32_0 : i32, i32
  }
  func.func @transform_2(%arg0: i32) -> (i32, i32) {
    %c0_i32 = arith.constant 0 : i32
    %c0_i32_0 = arith.constant 0 : i32
    %c0_i32_1 = arith.constant 0 : i32
    return %c0_i32, %c0_i32_0 : i32, i32
  }
  func.func @transform_3(%arg0: i32) -> (i32, i32) {
    %c0_i32 = arith.constant 0 : i32
    %c0_i32_0 = arith.constant 0 : i32
    return %arg0, %c0_i32 : i32, i32
  }
}

</mosaic_0001>

<bundles_post_ra>
// kernel: tpu_custom_call.1
= control target key start
LH: loop header
LB: loop body
LE: loop exit
PB: predicated region body
PF: predicated region fallthrough
CT: control target
= control target key end

     0   :  { %s319_s0 = inlined_call_operand.vmem [shape: bf16[32,128], index: 0, kind: input, shape index: {}]   ;;  %s320_s1 = inlined_call_operand.vmem [shape: bf16[128,32], index: 1, kind: input, shape index: {}]   ;;  %s321_s2 = inlined_call_operand.vmem [shape: f32[1,32], index: 2, kind: input, shape index: {}]   ;;  %s322_s3 = inlined_call_operand.hbm [shape: f32[32,32], index: 3, kind: output, shape index: {}]  }
   0x1   :  { %v217_v0 = vld [vmem:[%s320_s1] sm:$0xff]   ;;  %v218_v1 = vld [vmem:[%s320_s1 + $0x8] sm:$0xff]   ;;  %v219_v2 = vld [vmem:[%s320_s1 + $0x10] sm:$0xff]  }
   0x2   :  { %194 = vmatprep.subr.bf16.mxu0 %v217_v0  ;;  %v220_v3 = vld [vmem:[%s320_s1 + $0x18] sm:$0xff]   ;;  %v225_v4 = vld [vmem:[%s319_s0] sm:$0xff]  }
   0x3   :  { %195 = vmatpush3.bf16.msra.mxu0 %v217_v0  ;;  %210 = vmatprep.mubr.bf16.mxu0 %v225_v4 }
   0x4   :  { %196 = vmatprep.subr.bf16.mxu0 %v218_v1 }
   0x7   :  { %197 = vmatpush3.bf16.msra.mxu0 %v218_v1 }
   0x8   :  { %198 = vmatprep.subr.bf16.mxu0 %v219_v2 }
   0x9   :  { %8 = vsyncpa [#allocation3], 0  ;;  %v221_v5 = vld [vmem:[%s320_s1 + $0x20] sm:$0xff]   ;;  %v222_v6 = vld [vmem:[%s320_s1 + $0x28] sm:$0xff]   ;;  %vm152_vm0 = vcmask 261120   ;;  %s251_s7 = smov [#allocation2]  }
   0xa   :  { %v223_v7 = vld [vmem:[%s320_s1 + $0x30] sm:$0xff]   ;;  %v224_v8 = vld [vmem:[%s320_s1 + $0x38] sm:$0xff]   ;;  %v226_v9 = vld [vmem:[%s319_s0 + $0x8] sm:$0xff]   ;;  %s162_s8 = sshll.u32 %s251_s7, 4  ;;  %s163_s8 = int_to_ptr.vmem [resolvable:$true] %s162_s8 }
   0xb   :  { %199 = vmatpush3.bf16.msra.mxu0 %v219_v2  ;;  %v173_v10 = vld [vmem:[%s321_s2] ss:$0 sm:$0xff]  ;;  %s227_s0 = scalar_lea.vmem %s163_s8, 512  ;;  %p232_p1 = scmp.lt.s32.totalorder %s163_s8, %s163_s8 }
   0xc   :  { %200 = vmatprep.subr.bf16.mxu0 %v220_v3  ;;  %p228_p0 = scmp.ne.s32.totalorder %s163_s8, %s227_s0  ;;  %p233_p2 = scmp.lt.s32.totalorder %s227_s0, %s227_s0 }
   0xe   :  { %p234_p3 = por %p233_p2, %p232_p1 }
   0xf   :  { %201 = vmatpush3.bf16.msra.mxu0 %v220_v3 }
  0x10   :  { %202 = vmatprep.subr.bf16.mxu0 %v221_v5  ;;  %p235_p4 = pnand %p234_p3, %p228_p0 }
  0x13   :  { %203 = vmatpush3.bf16.msra.mxu0 %v221_v5 }
  0x14   :  { %204 = vmatprep.subr.bf16.mxu0 %v222_v6 }
  0x17   :  { %205 = vmatpush3.bf16.msra.mxu0 %v222_v6 }
  0x18   :  { %206 = vmatprep.subr.bf16.mxu0 %v223_v7 }
  0x1b   :  { %207 = vmatpush3.bf16.msra.mxu0 %v223_v7 }
  0x1c   :  { %208 = vmatprep.subr.bf16.mxu0 %v224_v8 }
  0x1f   :  { %209 = vmatpush3.bf16.msra.mxu0 %v224_v8 }
  0x22   :  { %211 = vmatmul.mubr.bf16.vlgmr.msra.gmra.mrb[0].mxu0 %v226_v9 }
  0xf5   :  { %v212_v11 = vpop.f32.mrb[0].mxu0 }
  0xf6   :  { %v146_v12 = vadd.f32 %v212_v11, %v173_v10  ;;  %v137_v13 = vpop.f32.mrb[1].mxu0 }
  0xf7   :  { %v138_v14 = vadd.f32 %v173_v10, %v137_v13  ;;  %v213_v15 = vpop.f32.mrb[2].mxu0 }
  0xf8   :  { %155 = vst.msk [vmem:[#allocation2 + $0x10] sm:$0xff] %vm152_vm0, %v146_v12  ;;  %v149_v16 = vadd.f32 %v213_v15, %v173_v10  ;;  %v140_v17 = vpop.f32.mrb[3].mxu0 }
  0xf9   :  { %153 = vst.msk [vmem:[#allocation2] sm:$0xff] %vm152_vm0, %v138_v14  ;;  %v141_v18 = vadd.f32 %v173_v10, %v140_v17 }
  0xfa   :  { %156 = vst.msk [vmem:[#allocation2 + $0x18] sm:$0xff] %vm152_vm0, %v149_v16 }
  0xfb   :  { %154 = vst.msk [vmem:[#allocation2 + $0x8] sm:$0xff] %vm152_vm0, %v141_v18 }
  0xfc   :  { %238 = shalt.err (!%p235_p4)
}
  0xfd   :  { %s239_s9 = scalar_lea.hbm %s322_s3, 512 }
  0xfe   :  { %p240_p5 = scmp.ne.s32.totalorder %s322_s3, %s239_s9  ;;  %p243_p6 = scmp.lt.u32.totalorder %s239_s9, %s322_s3 }
 0x100   :  { %p245_p7 = pnand %p243_p6, %p240_p5 }
 0x102   :  { %248 = shalt.err (!%p245_p7)
}
 0x103   :  { %s252_s14 = smov 128   ;;  %s253_s15 = smov 8  }
 0x104   :  { %168 = dma.vmem_to_hbm [thread:$0]  %s163_s8, 512, %s322_s3, [#allocation3], %s252_s14, %s252_s14, %s253_s15  }
 0x105   :  { %249 = dma.done.wait [#allocation3], 512  }
 0x106   :  { %250 = vsyncadd [#allocation3], 4294966784 }
 0x107   :  { %172 = vsyncpa [#allocation3], 1 }

// kernel: tpu_custom_call.1
= control target key start
LH: loop header
LB: loop body
LE: loop exit
PB: predicated region body
PF: predicated region fallthrough
CT: control target
= control target key end

     0   :  { %s319_s0 = inlined_call_operand.vmem [shape: bf16[32,128], index: 0, kind: input, shape index: {}]   ;;  %s320_s1 = inlined_call_operand.vmem [shape: bf16[128,32], index: 1, kind: input, shape index: {}]   ;;  %s321_s2 = inlined_call_operand.vmem [shape: f32[1,32], index: 2, kind: input, shape index: {}]   ;;  %s322_s3 = inlined_call_operand.hbm [shape: f32[32,32], index: 3, kind: output, shape index: {}]  }
   0x1   :  { %v217_v0 = vld [vmem:[%s320_s1] sm:$0xff]   ;;  %v218_v1 = vld [vmem:[%s320_s1 + $0x8] sm:$0xff]   ;;  %v219_v2 = vld [vmem:[%s320_s1 + $0x10] sm:$0xff]  }
   0x2   :  { %194 = vmatprep.subr.bf16.mxu0 %v217_v0  ;;  %v220_v3 = vld [vmem:[%s320_s1 + $0x18] sm:$0xff]   ;;  %v225_v4 = vld [vmem:[%s319_s0] sm:$0xff]  }
   0x3   :  { %195 = vmatpush3.bf16.msra.mxu0 %v217_v0  ;;  %210 = vmatprep.mubr.bf16.mxu0 %v225_v4 }
   0x4   :  { %196 = vmatprep.subr.bf16.mxu0 %v218_v1 }
   0x7   :  { %197 = vmatpush3.bf16.msra.mxu0 %v218_v1 }
   0x8   :  { %198 = vmatprep.subr.bf16.mxu0 %v219_v2 }
   0x9   :  { %8 = vsyncpa [#allocation3], 0  ;;  %v221_v5 = vld [vmem:[%s320_s1 + $0x20] sm:$0xff]   ;;  %v222_v6 = vld [vmem:[%s320_s1 + $0x28] sm:$0xff]   ;;  %vm152_vm0 = vcmask 261120   ;;  %s251_s7 = smov [#allocation2]  }
   0xa   :  { %v223_v7 = vld [vmem:[%s320_s1 + $0x30] sm:$0xff]   ;;  %v224_v8 = vld [vmem:[%s320_s1 + $0x38] sm:$0xff]   ;;  %v226_v9 = vld [vmem:[%s319_s0 + $0x8] sm:$0xff]   ;;  %s162_s8 = sshll.u32 %s251_s7, 4  ;;  %s163_s8 = int_to_ptr.vmem [resolvable:$true] %s162_s8 }
   0xb   :  { %199 = vmatpush3.bf16.msra.mxu0 %v219_v2  ;;  %v173_v10 = vld [vmem:[%s321_s2] ss:$0 sm:$0xff]  ;;  %s227_s0 = scalar_lea.vmem %s163_s8, 512  ;;  %p232_p1 = scmp.lt.s32.totalorder %s163_s8, %s163_s8 }
   0xc   :  { %200 = vmatprep.subr.bf16.mxu0 %v220_v3  ;;  %p228_p0 = scmp.ne.s32.totalorder %s163_s8, %s227_s0  ;;  %p233_p2 = scmp.lt.s32.totalorder %s227_s0, %s227_s0 }
   0xe   :  { %p234_p3 = por %p233_p2, %p232_p1 }
   0xf   :  { %201 = vmatpush3.bf16.msra.mxu0 %v220_v3 }
  0x10   :  { %202 = vmatprep.subr.bf16.mxu0 %v221_v5  ;;  %p235_p4 = pnand %p234_p3, %p228_p0 }
  0x13   :  { %203 = vmatpush3.bf16.msra.mxu0 %v221_v5 }
  0x14   :  { %204 = vmatprep.subr.bf16.mxu0 %v222_v6 }
  0x17   :  { %205 = vmatpush3.bf16.msra.mxu0 %v222_v6 }
  0x18   :  { %206 = vmatprep.subr.bf16.mxu0 %v223_v7 }
  0x1b   :  { %207 = vmatpush3.bf16.msra.mxu0 %v223_v7 }
  0x1c   :  { %208 = vmatprep.subr.bf16.mxu0 %v224_v8 }
  0x1f   :  { %209 = vmatpush3.bf16.msra.mxu0 %v224_v8 }
  0x22   :  { %211 = vmatmul.mubr.bf16.vlgmr.msra.gmra.mrb[0].mxu0 %v226_v9 }
  0xf5   :  { %v212_v11 = vpop.f32.mrb[0].mxu0 }
  0xf6   :  { %v146_v12 = vadd.f32 %v212_v11, %v173_v10  ;;  %v137_v13 = vpop.f32.mrb[1].mxu0 }
  0xf7   :  { %v138_v14 = vadd.f32 %v173_v10, %v137_v13  ;;  %v213_v15 = vpop.f32.mrb[2].mxu0 }
  0xf8   :  { %155 = vst.msk [vmem:[#allocation2 + $0x10] sm:$0xff] %vm152_vm0, %v146_v12  ;;  %v149_v16 = vadd.f32 %v213_v15, %v173_v10  ;;  %v140_v17 = vpop.f32.mrb[3].mxu0 }
  0xf9   :  { %153 = vst.msk [vmem:[#allocation2] sm:$0xff] %vm152_vm0, %v138_v14  ;;  %v141_v18 = vadd.f32 %v173_v10, %v140_v17 }
  0xfa   :  { %156 = vst.msk [vmem:[#allocation2 + $0x18] sm:$0xff] %vm152_vm0, %v149_v16 }
  0xfb   :  { %154 = vst.msk [vmem:[#allocation2 + $0x8] sm:$0xff] %vm152_vm0, %v141_v18 }
  0xfc   :  { %238 = shalt.err (!%p235_p4)
}
  0xfd   :  { %s239_s9 = scalar_lea.hbm %s322_s3, 512 }
  0xfe   :  { %p240_p5 = scmp.ne.s32.totalorder %s322_s3, %s239_s9  ;;  %p243_p6 = scmp.lt.u32.totalorder %s239_s9, %s322_s3 }
 0x100   :  { %p245_p7 = pnand %p243_p6, %p240_p5 }
 0x102   :  { %248 = shalt.err (!%p245_p7)
}
 0x103   :  { %s252_s14 = smov 128   ;;  %s253_s15 = smov 8  }
 0x104   :  { %168 = dma.vmem_to_hbm [thread:$0]  %s163_s8, 512, %s322_s3, [#allocation3], %s252_s14, %s252_s14, %s253_s15  }
 0x105   :  { %249 = dma.done.wait [#allocation3], 512  }
 0x106   :  { %250 = vsyncadd [#allocation3], 4294966784 }
 0x107   :  { %172 = vsyncpa [#allocation3], 1 }

</bundles_post_ra>
